<compile_context>
chip_gen: v7x
topology: tpu7x:2x2x1
jax: 0.10.0
libtpu: 0.0.40
codegen_flags: <defaults>
</compile_context>

<pallas_src>
import jax
import jax.numpy as jnp
from jax.experimental import pallas as pl
from jax.experimental.pallas import tpu as pltpu

_EPS = 1e-12               # torch F.normalize default: v / max(||v||_2, eps)
_LANE = 128
_SUBLANE = 8
_GRAN = _LANE * _SUBLANE   # 1024 faces = one full (8,128) tile per component
_DEFAULT_FACE_TILE = 8192


def _round_up(x, m):
    return (x + m - 1) // m * m


def _choose_face_tiling(B, Fn, face_tile):
    """Pick (tf, Fp): face-tile size and padded face count.

    Either tf == Fp (a single tile covering all faces, lane-padded) or tf is a
    multiple of 8*128 and Fp a multiple of tf, so every BlockSpec block
    satisfies the (8, 128) layout rule on its last two dims.
    """
    face_tile = max(int(face_tile), _GRAN)
    if B == 1:
        # v7x has 2 TensorCores; keep >= 2 face-axis grid steps when the mesh
        # is big enough so ("parallel","parallel") can shard them.
        face_tile = min(face_tile, max(_GRAN, _round_up(-(-Fn // 2), _GRAN)))
    tf = _round_up(face_tile, _GRAN)
    f_lane = _round_up(Fn, _LANE)
    if f_lane <= tf:
        return f_lane, f_lane          # single face tile
    return tf, _round_up(Fn, tf)       # multi-tile, tf | Fp


def _normal_vector_loss_kernel(x_ref, o_ref):
    # x_ref block: (1, 18, R, 128); row r = 3*c + p
    #   c: 0..2 -> out x/y/z, 3..5 -> gt x/y/z ; p: face corner 0/1/2
    # o_ref block: (1, 3, R, 128); rows = cos1, cos2, cos3
    def row(i):
        return x_ref[0, i]             # dense (R, 128) tile

    ox0, ox1, ox2 = row(0), row(1), row(2)
    oy0, oy1, oy2 = row(3), row(4), row(5)
    oz0, oz1, oz2 = row(6), row(7), row(8)
    gx0, gx1, gx2 = row(9), row(10), row(11)
    gy0, gy1, gy2 = row(12), row(13), row(14)
    gz0, gz1, gz2 = row(15), row(16), row(17)

    def normalize3(vx, vy, vz):
        # Mirrors torch F.normalize: v / max(||v||_2, eps)
        n = jnp.sqrt(vx * vx + vy * vy + vz * vz)
        d = jnp.maximum(n, _EPS)
        return vx / d, vy / d, vz / d

    # Predicted edge vectors, normalized.
    e1x, e1y, e1z = normalize3(ox1 - ox0, oy1 - oy0, oz1 - oz0)
    e2x, e2y, e2z = normalize3(ox2 - ox0, oy2 - oy0, oz2 - oz0)
    e3x, e3y, e3z = normalize3(ox2 - ox1, oy2 - oy1, oz2 - oz1)

    # GT edge vectors, normalized; cross; renormalize -> gt face normal.
    g1x, g1y, g1z = normalize3(gx1 - gx0, gy1 - gy0, gz1 - gz0)
    g2x, g2y, g2z = normalize3(gx2 - gx0, gy2 - gy0, gz2 - gz0)
    nx, ny, nz = normalize3(g1y * g2z - g1z * g2y,
                            g1z * g2x - g1x * g2z,
                            g1x * g2y - g1y * g2x)

    # Three direct lane-dense stores (no sublane concat / temp).
    o_ref[0, 0] = jnp.abs(e1x * nx + e1y * ny + e1z * nz)
    o_ref[0, 1] = jnp.abs(e2x * nx + e2y * ny + e2z * nz)
    o_ref[0, 2] = jnp.abs(e3x * nx + e3y * ny + e3z * nz)


def normal_vector_loss(coord_out, coord_gt, face, *,
                       face_tile=_DEFAULT_FACE_TILE, return_packed=False):
    """coord_out, coord_gt: (B, V, 3) float32; face: (F, 3) int.
    Returns (B, 3*F, 1) matching the PyTorch module (or (B, 3, F) if
    return_packed=True, skipping the final relayout)."""
    B, V, C = coord_out.shape
    assert C == 3
    face = jnp.asarray(face, jnp.int32)
    Fn = face.shape[0]

    tf, Fp = _choose_face_tiling(B, Fn, face_tile)
    R = tf // _LANE

    # Pad the face table with vertex 0 (padded lanes compute harmless finite
    # values and are sliced off after the kernel).
    if Fp != Fn:
        face_p = jnp.concatenate(
            [face, jnp.zeros((Fp - Fn, 3), jnp.int32)], axis=0)
    else:
        face_p = face

    # Glue (single fused gather): transpose both coord tensors once to (B,3,V),
    # stack -> (B,6,V), one lane-axis gather with the concatenated 3*Fp index
    # vector, then reshape to a sublane/lane-dense (B, 18, Fp/128, 128) slab.
    # Row r = 3*c + p (c: channel, p: face corner); face f -> (f//128, f%128).
    coordT = jnp.concatenate(
        [jnp.transpose(coord_out.astype(jnp.float32), (0, 2, 1)),
         jnp.transpose(coord_gt.astype(jnp.float32), (0, 2, 1))], axis=1)
    idx = face_p.T.reshape(-1)                       # (3*Fp,), corner-major
    stacked = jnp.take(coordT, idx, axis=2).reshape(B, 18, Fp // _LANE, _LANE)

    grid = (B, Fp // tf)
    out = pl.pallas_call(
        _normal_vector_loss_kernel,
        out_shape=jax.ShapeDtypeStruct((B, 3, Fp // _LANE, _LANE), jnp.float32),
        grid_spec=pltpu.PrefetchScalarGridSpec(
            num_scalar_prefetch=0,
            grid=grid,
            in_specs=[pl.BlockSpec((1, 18, R, _LANE),
                                   lambda b, f: (b, 0, f, 0))],
            out_specs=pl.BlockSpec((1, 3, R, _LANE),
                                   lambda b, f: (b, 0, f, 0)),
        ),
        compiler_params=pltpu.CompilerParams(
            dimension_semantics=("parallel", "parallel"),
            vmem_limit_bytes=32 * 1024 * 1024),
    )(stacked)

    packed = out.reshape(B, 3, Fp)[:, :, :Fn]        # (B, 3, Fn)
    if return_packed:
        return packed
    # (B, 3, Fn) -> (B, 3*Fn, 1): matches torch.cat((cos1, cos2, cos3), dim=1).
    return packed.reshape(B, 3 * Fn, 1)


def _reference(coord_out, coord_gt, face):
    """Pure-JAX reference mirroring the PyTorch forward."""
    face = jnp.asarray(face, jnp.int32)

    def normalize(v):
        n = jnp.sqrt(jnp.sum(v * v, axis=2, keepdims=True))
        return v / jnp.maximum(n, _EPS)

    v1o = normalize(coord_out[:, face[:, 1], :] - coord_out[:, face[:, 0], :])
    v2o = normalize(coord_out[:, face[:, 2], :] - coord_out[:, face[:, 0], :])
    v3o = normalize(coord_out[:, face[:, 2], :] - coord_out[:, face[:, 1], :])
    v1g = normalize(coord_gt[:, face[:, 1], :] - coord_gt[:, face[:, 0], :])
    v2g = normalize(coord_gt[:, face[:, 2], :] - coord_gt[:, face[:, 0], :])
    ng = normalize(jnp.cross(v1g, v2g))
    cos1 = jnp.abs(jnp.sum(v1o * ng, axis=2, keepdims=True))
    cos2 = jnp.abs(jnp.sum(v2o * ng, axis=2, keepdims=True))
    cos3 = jnp.abs(jnp.sum(v3o * ng, axis=2, keepdims=True))
    return jnp.concatenate([cos1, cos2, cos3], axis=1)


def _well_conditioned_faces(coord_gt, face, thresh=1e-2):
    """Mask (B, F) of gt triangles whose edge vectors are not near-parallel.
    Near-degenerate triangles have an ill-conditioned normal; tiny rounding
    differences get amplified there, so they are excluded from the tight
    comparison (both implementations still produce finite, clamped values)."""
    face = jnp.asarray(face, jnp.int32)
    d1 = coord_gt[:, face[:, 1], :] - coord_gt[:, face[:, 0], :]
    d2 = coord_gt[:, face[:, 2], :] - coord_gt[:, face[:, 0], :]
    num = jnp.linalg.norm(jnp.cross(d1, d2), axis=2)
    den = jnp.linalg.norm(d1, axis=2) * jnp.linalg.norm(d2, axis=2)
    return num > thresh * jnp.maximum(den, _EPS)


def _check(loss, ref, mask_face, atol=1e-4):
    assert bool(jnp.all(jnp.isfinite(loss))), "non-finite loss values"
    mask = jnp.concatenate([mask_face, mask_face, mask_face], axis=1)[..., None]
    max_err = float(jnp.max(jnp.where(mask, jnp.abs(loss - ref), 0.0)))
    assert max_err <= atol, f"max masked error {max_err}"


if __name__ == "__main__":
    key = jax.random.PRNGKey(0)
    loss_fn = jax.jit(normal_vector_loss)

    # Test 1: small shapes (B=2, V=16, F=8) — single face tile, lane padding.
    k1, k2, k3, k4, k5, k6 = jax.random.split(key, 6)
    B, V, Fn = 2, 16, 8
    coord_out = jax.random.normal(k1, (B, V, 3), dtype=jnp.float32)
    coord_gt = jax.random.normal(k2, (B, V, 3), dtype=jnp.float32)
    face = jax.random.randint(k3, (Fn, 3), 0, V, dtype=jnp.int32)

    loss = jax.block_until_ready(loss_fn(coord_out, coord_gt, face))
    ref = _reference(coord_out, coord_gt, face)
    assert loss.shape == (B, 3 * Fn, 1), loss.shape
    mask1 = _well_conditioned_faces(coord_gt, face)
    _check(loss, ref, mask1)

    packed = normal_vector_loss(coord_out, coord_gt, face, return_packed=True)
    assert packed.shape == (B, 3, Fn), packed.shape
    _check(packed.reshape(B, 3 * Fn, 1), ref, mask1)

    # Test 2: B=1, multi-tile face axis (v7x keeps >=2 face tiles) + ragged pad.
    B2, V2, Fn2 = 1, 64, 2500
    co2 = jax.random.normal(k4, (B2, V2, 3), dtype=jnp.float32)
    cg2 = jax.random.normal(k5, (B2, V2, 3), dtype=jnp.float32)
    face2 = jax.random.randint(k6, (Fn2, 3), 0, V2, dtype=jnp.int32)

    loss2 = jax.block_until_ready(loss_fn(co2, cg2, face2))
    ref2 = _reference(co2, cg2, face2)
    assert loss2.shape == (B2, 3 * Fn2, 1), loss2.shape
    _check(loss2, ref2, _well_conditioned_faces(cg2, face2))

    print("KERNEL_OK")
</pallas_src>

<mosaic_0001>
module attributes {stable_mosaic.version = 11 : i64} {
  func.func @_normal_vector_loss_kernel(%arg0: i32, %arg1: i32, %arg2: memref<1x18x1x128xf32, #tpu.memory_space<vmem>>, %arg3: memref<1x3x1x128xf32, #tpu.memory_space<vmem>>) attributes {dimension_semantics = [#tpu.dimension_semantics<parallel>, #tpu.dimension_semantics<parallel>], iteration_bounds = array<i64: 2, 1>, scalar_prefetch = 0 : i64, scratch_operands = 0 : i64, tpu.core_type = #tpu.core_type<tc>, window_params = [{transform_indices = @transform_0, window_bounds = array<i64: 1, 18, 1, 128>}, {transform_indices = @transform_1, window_bounds = array<i64: 1, 3, 1, 128>}]} {
    %c0 = arith.constant 0 : index
    %c0_0 = arith.constant 0 : index
    %c0_1 = arith.constant 0 : index
    %c0_2 = arith.constant 0 : index
    %0 = vector.load %arg2[%c0, %c0_0, %c0_1, %c0_2] : memref<1x18x1x128xf32, #tpu.memory_space<vmem>>, vector<1x1x1x128xf32>
    %1 = vector.shape_cast %0 : vector<1x1x1x128xf32> to vector<1x128xf32>
    %c0_3 = arith.constant 0 : index
    %c1 = arith.constant 1 : index
    %c0_4 = arith.constant 0 : index
    %c0_5 = arith.constant 0 : index
    %2 = vector.load %arg2[%c0_3, %c1, %c0_4, %c0_5] : memref<1x18x1x128xf32, #tpu.memory_space<vmem>>, vector<1x1x1x128xf32>
    %3 = vector.shape_cast %2 : vector<1x1x1x128xf32> to vector<1x128xf32>
    %c0_6 = arith.constant 0 : index
    %c2 = arith.constant 2 : index
    %c0_7 = arith.constant 0 : index
    %c0_8 = arith.constant 0 : index
    %4 = vector.load %arg2[%c0_6, %c2, %c0_7, %c0_8] : memref<1x18x1x128xf32, #tpu.memory_space<vmem>>, vector<1x1x1x128xf32>
    %5 = vector.shape_cast %4 : vector<1x1x1x128xf32> to vector<1x128xf32>
    %c0_9 = arith.constant 0 : index
    %c3 = arith.constant 3 : index
    %c0_10 = arith.constant 0 : index
    %c0_11 = arith.constant 0 : index
    %6 = vector.load %arg2[%c0_9, %c3, %c0_10, %c0_11] : memref<1x18x1x128xf32, #tpu.memory_space<vmem>>, vector<1x1x1x128xf32>
    %7 = vector.shape_cast %6 : vector<1x1x1x128xf32> to vector<1x128xf32>
    %c0_12 = arith.constant 0 : index
    %c4 = arith.constant 4 : index
    %c0_13 = arith.constant 0 : index
    %c0_14 = arith.constant 0 : index
    %8 = vector.load %arg2[%c0_12, %c4, %c0_13, %c0_14] : memref<1x18x1x128xf32, #tpu.memory_space<vmem>>, vector<1x1x1x128xf32>
    %9 = vector.shape_cast %8 : vector<1x1x1x128xf32> to vector<1x128xf32>
    %c0_15 = arith.constant 0 : index
    %c5 = arith.constant 5 : index
    %c0_16 = arith.constant 0 : index
    %c0_17 = arith.constant 0 : index
    %10 = vector.load %arg2[%c0_15, %c5, %c0_16, %c0_17] : memref<1x18x1x128xf32, #tpu.memory_space<vmem>>, vector<1x1x1x128xf32>
    %11 = vector.shape_cast %10 : vector<1x1x1x128xf32> to vector<1x128xf32>
    %c0_18 = arith.constant 0 : index
    %c6 = arith.constant 6 : index
    %c0_19 = arith.constant 0 : index
    %c0_20 = arith.constant 0 : index
    %12 = vector.load %arg2[%c0_18, %c6, %c0_19, %c0_20] : memref<1x18x1x128xf32, #tpu.memory_space<vmem>>, vector<1x1x1x128xf32>
    %13 = vector.shape_cast %12 : vector<1x1x1x128xf32> to vector<1x128xf32>
    %c0_21 = arith.constant 0 : index
    %c7 = arith.constant 7 : index
    %c0_22 = arith.constant 0 : index
    %c0_23 = arith.constant 0 : index
    %14 = vector.load %arg2[%c0_21, %c7, %c0_22, %c0_23] : memref<1x18x1x128xf32, #tpu.memory_space<vmem>>, vector<1x1x1x128xf32>
    %15 = vector.shape_cast %14 : vector<1x1x1x128xf32> to vector<1x128xf32>
    %c0_24 = arith.constant 0 : index
    %c8 = arith.constant 8 : index
    %c0_25 = arith.constant 0 : index
    %c0_26 = arith.constant 0 : index
    %16 = vector.load %arg2[%c0_24, %c8, %c0_25, %c0_26] : memref<1x18x1x128xf32, #tpu.memory_space<vmem>>, vector<1x1x1x128xf32>
    %17 = vector.shape_cast %16 : vector<1x1x1x128xf32> to vector<1x128xf32>
    %c0_27 = arith.constant 0 : index
    %c9 = arith.constant 9 : index
    %c0_28 = arith.constant 0 : index
    %c0_29 = arith.constant 0 : index
    %18 = vector.load %arg2[%c0_27, %c9, %c0_28, %c0_29] : memref<1x18x1x128xf32, #tpu.memory_space<vmem>>, vector<1x1x1x128xf32>
    %19 = vector.shape_cast %18 : vector<1x1x1x128xf32> to vector<1x128xf32>
    %c0_30 = arith.constant 0 : index
    %c10 = arith.constant 10 : index
    %c0_31 = arith.constant 0 : index
    %c0_32 = arith.constant 0 : index
    %20 = vector.load %arg2[%c0_30, %c10, %c0_31, %c0_32] : memref<1x18x1x128xf32, #tpu.memory_space<vmem>>, vector<1x1x1x128xf32>
    %21 = vector.shape_cast %20 : vector<1x1x1x128xf32> to vector<1x128xf32>
    %c0_33 = arith.constant 0 : index
    %c11 = arith.constant 11 : index
    %c0_34 = arith.constant 0 : index
    %c0_35 = arith.constant 0 : index
    %22 = vector.load %arg2[%c0_33, %c11, %c0_34, %c0_35] : memref<1x18x1x128xf32, #tpu.memory_space<vmem>>, vector<1x1x1x128xf32>
    %23 = vector.shape_cast %22 : vector<1x1x1x128xf32> to vector<1x128xf32>
    %c0_36 = arith.constant 0 : index
    %c12 = arith.constant 12 : index
    %c0_37 = arith.constant 0 : index
    %c0_38 = arith.constant 0 : index
    %24 = vector.load %arg2[%c0_36, %c12, %c0_37, %c0_38] : memref<1x18x1x128xf32, #tpu.memory_space<vmem>>, vector<1x1x1x128xf32>
    %25 = vector.shape_cast %24 : vector<1x1x1x128xf32> to vector<1x128xf32>
    %c0_39 = arith.constant 0 : index
    %c13 = arith.constant 13 : index
    %c0_40 = arith.constant 0 : index
    %c0_41 = arith.constant 0 : index
    %26 = vector.load %arg2[%c0_39, %c13, %c0_40, %c0_41] : memref<1x18x1x128xf32, #tpu.memory_space<vmem>>, vector<1x1x1x128xf32>
    %27 = vector.shape_cast %26 : vector<1x1x1x128xf32> to vector<1x128xf32>
    %c0_42 = arith.constant 0 : index
    %c14 = arith.constant 14 : index
    %c0_43 = arith.constant 0 : index
    %c0_44 = arith.constant 0 : index
    %28 = vector.load %arg2[%c0_42, %c14, %c0_43, %c0_44] : memref<1x18x1x128xf32, #tpu.memory_space<vmem>>, vector<1x1x1x128xf32>
    %29 = vector.shape_cast %28 : vector<1x1x1x128xf32> to vector<1x128xf32>
    %c0_45 = arith.constant 0 : index
    %c15 = arith.constant 15 : index
    %c0_46 = arith.constant 0 : index
    %c0_47 = arith.constant 0 : index
    %30 = vector.load %arg2[%c0_45, %c15, %c0_46, %c0_47] : memref<1x18x1x128xf32, #tpu.memory_space<vmem>>, vector<1x1x1x128xf32>
    %31 = vector.shape_cast %30 : vector<1x1x1x128xf32> to vector<1x128xf32>
    %c0_48 = arith.constant 0 : index
    %c16 = arith.constant 16 : index
    %c0_49 = arith.constant 0 : index
    %c0_50 = arith.constant 0 : index
    %32 = vector.load %arg2[%c0_48, %c16, %c0_49, %c0_50] : memref<1x18x1x128xf32, #tpu.memory_space<vmem>>, vector<1x1x1x128xf32>
    %33 = vector.shape_cast %32 : vector<1x1x1x128xf32> to vector<1x128xf32>
    %c0_51 = arith.constant 0 : index
    %c17 = arith.constant 17 : index
    %c0_52 = arith.constant 0 : index
    %c0_53 = arith.constant 0 : index
    %34 = vector.load %arg2[%c0_51, %c17, %c0_52, %c0_53] : memref<1x18x1x128xf32, #tpu.memory_space<vmem>>, vector<1x1x1x128xf32>
    %35 = vector.shape_cast %34 : vector<1x1x1x128xf32> to vector<1x128xf32>
    %36 = arith.subf %3, %1 : vector<1x128xf32>
    %37 = arith.subf %9, %7 : vector<1x128xf32>
    %38 = arith.subf %15, %13 : vector<1x128xf32>
    %39 = arith.mulf %36, %36 : vector<1x128xf32>
    %40 = arith.mulf %37, %37 : vector<1x128xf32>
    %41 = arith.addf %39, %40 : vector<1x128xf32>
    %42 = arith.mulf %38, %38 : vector<1x128xf32>
    %43 = arith.addf %41, %42 : vector<1x128xf32>
    %44 = math.sqrt %43 : vector<1x128xf32>
    %cst = arith.constant 9.99999996E-13 : f32
    %45 = vector.broadcast %cst : f32 to vector<1x128xf32>
    %46 = arith.maximumf %44, %45 : vector<1x128xf32>
    %47 = arith.divf %36, %46 : vector<1x128xf32>
    %48 = arith.divf %37, %46 : vector<1x128xf32>
    %49 = arith.divf %38, %46 : vector<1x128xf32>
    %50 = arith.subf %5, %1 : vector<1x128xf32>
    %51 = arith.subf %11, %7 : vector<1x128xf32>
    %52 = arith.subf %17, %13 : vector<1x128xf32>
    %53 = arith.mulf %50, %50 : vector<1x128xf32>
    %54 = arith.mulf %51, %51 : vector<1x128xf32>
    %55 = arith.addf %53, %54 : vector<1x128xf32>
    %56 = arith.mulf %52, %52 : vector<1x128xf32>
    %57 = arith.addf %55, %56 : vector<1x128xf32>
    %58 = math.sqrt %57 : vector<1x128xf32>
    %cst_54 = arith.constant 9.99999996E-13 : f32
    %59 = vector.broadcast %cst_54 : f32 to vector<1x128xf32>
    %60 = arith.maximumf %58, %59 : vector<1x128xf32>
    %61 = arith.divf %50, %60 : vector<1x128xf32>
    %62 = arith.divf %51, %60 : vector<1x128xf32>
    %63 = arith.divf %52, %60 : vector<1x128xf32>
    %64 = arith.subf %5, %3 : vector<1x128xf32>
    %65 = arith.subf %11, %9 : vector<1x128xf32>
    %66 = arith.subf %17, %15 : vector<1x128xf32>
    %67 = arith.mulf %64, %64 : vector<1x128xf32>
    %68 = arith.mulf %65, %65 : vector<1x128xf32>
    %69 = arith.addf %67, %68 : vector<1x128xf32>
    %70 = arith.mulf %66, %66 : vector<1x128xf32>
    %71 = arith.addf %69, %70 : vector<1x128xf32>
    %72 = math.sqrt %71 : vector<1x128xf32>
    %cst_55 = arith.constant 9.99999996E-13 : f32
    %73 = vector.broadcast %cst_55 : f32 to vector<1x128xf32>
    %74 = arith.maximumf %72, %73 : vector<1x128xf32>
    %75 = arith.divf %64, %74 : vector<1x128xf32>
    %76 = arith.divf %65, %74 : vector<1x128xf32>
    %77 = arith.divf %66, %74 : vector<1x128xf32>
    %78 = arith.subf %21, %19 : vector<1x128xf32>
    %79 = arith.subf %27, %25 : vector<1x128xf32>
    %80 = arith.subf %33, %31 : vector<1x128xf32>
    %81 = arith.mulf %78, %78 : vector<1x128xf32>
    %82 = arith.mulf %79, %79 : vector<1x128xf32>
    %83 = arith.addf %81, %82 : vector<1x128xf32>
    %84 = arith.mulf %80, %80 : vector<1x128xf32>
    %85 = arith.addf %83, %84 : vector<1x128xf32>
    %86 = math.sqrt %85 : vector<1x128xf32>
    %cst_56 = arith.constant 9.99999996E-13 : f32
    %87 = vector.broadcast %cst_56 : f32 to vector<1x128xf32>
    %88 = arith.maximumf %86, %87 : vector<1x128xf32>
    %89 = arith.divf %78, %88 : vector<1x128xf32>
    %90 = arith.divf %79, %88 : vector<1x128xf32>
    %91 = arith.divf %80, %88 : vector<1x128xf32>
    %92 = arith.subf %23, %19 : vector<1x128xf32>
    %93 = arith.subf %29, %25 : vector<1x128xf32>
    %94 = arith.subf %35, %31 : vector<1x128xf32>
    %95 = arith.mulf %92, %92 : vector<1x128xf32>
    %96 = arith.mulf %93, %93 : vector<1x128xf32>
    %97 = arith.addf %95, %96 : vector<1x128xf32>
    %98 = arith.mulf %94, %94 : vector<1x128xf32>
    %99 = arith.addf %97, %98 : vector<1x128xf32>
    %100 = math.sqrt %99 : vector<1x128xf32>
    %cst_57 = arith.constant 9.99999996E-13 : f32
    %101 = vector.broadcast %cst_57 : f32 to vector<1x128xf32>
    %102 = arith.maximumf %100, %101 : vector<1x128xf32>
    %103 = arith.divf %92, %102 : vector<1x128xf32>
    %104 = arith.divf %93, %102 : vector<1x128xf32>
    %105 = arith.divf %94, %102 : vector<1x128xf32>
    %106 = arith.mulf %90, %105 : vector<1x128xf32>
    %107 = arith.mulf %91, %104 : vector<1x128xf32>
    %108 = arith.subf %106, %107 : vector<1x128xf32>
    %109 = arith.mulf %91, %103 : vector<1x128xf32>
    %110 = arith.mulf %89, %105 : vector<1x128xf32>
    %111 = arith.subf %109, %110 : vector<1x128xf32>
    %112 = arith.mulf %89, %104 : vector<1x128xf32>
    %113 = arith.mulf %90, %103 : vector<1x128xf32>
    %114 = arith.subf %112, %113 : vector<1x128xf32>
    %115 = arith.mulf %108, %108 : vector<1x128xf32>
    %116 = arith.mulf %111, %111 : vector<1x128xf32>
    %117 = arith.addf %115, %116 : vector<1x128xf32>
    %118 = arith.mulf %114, %114 : vector<1x128xf32>
    %119 = arith.addf %117, %118 : vector<1x128xf32>
    %120 = math.sqrt %119 : vector<1x128xf32>
    %cst_58 = arith.constant 9.99999996E-13 : f32
    %121 = vector.broadcast %cst_58 : f32 to vector<1x128xf32>
    %122 = arith.maximumf %120, %121 : vector<1x128xf32>
    %123 = arith.divf %108, %122 : vector<1x128xf32>
    %124 = arith.divf %111, %122 : vector<1x128xf32>
    %125 = arith.divf %114, %122 : vector<1x128xf32>
    %126 = arith.mulf %47, %123 : vector<1x128xf32>
    %127 = arith.mulf %48, %124 : vector<1x128xf32>
    %128 = arith.addf %126, %127 : vector<1x128xf32>
    %129 = arith.mulf %49, %125 : vector<1x128xf32>
    %130 = arith.addf %128, %129 : vector<1x128xf32>
    %131 = math.absf %130 : vector<1x128xf32>
    %c0_59 = arith.constant 0 : index
    %c0_60 = arith.constant 0 : index
    %c0_61 = arith.constant 0 : index
    %c0_62 = arith.constant 0 : index
    %132 = vector.load %arg3[%c0_59, %c0_60, %c0_61, %c0_62] : memref<1x3x1x128xf32, #tpu.memory_space<vmem>>, vector<1x1x1x128xf32>
    %133 = vector.shape_cast %132 : vector<1x1x1x128xf32> to vector<1x128xf32>
    %134 = vector.shape_cast %131 : vector<1x128xf32> to vector<1x1x1x128xf32>
    tpu.vector_store %arg3[%c0_59, %c0_60, %c0_61, %c0_62], %134 {strides = array<i32>} : memref<1x3x1x128xf32, #tpu.memory_space<vmem>>, vector<1x1x1x128xf32>,
    %135 = arith.mulf %61, %123 : vector<1x128xf32>
    %136 = arith.mulf %62, %124 : vector<1x128xf32>
    %137 = arith.addf %135, %136 : vector<1x128xf32>
    %138 = arith.mulf %63, %125 : vector<1x128xf32>
    %139 = arith.addf %137, %138 : vector<1x128xf32>
    %140 = math.absf %139 : vector<1x128xf32>
    %c0_63 = arith.constant 0 : index
    %c1_64 = arith.constant 1 : index
    %c0_65 = arith.constant 0 : index
    %c0_66 = arith.constant 0 : index
    %141 = vector.load %arg3[%c0_63, %c1_64, %c0_65, %c0_66] : memref<1x3x1x128xf32, #tpu.memory_space<vmem>>, vector<1x1x1x128xf32>
    %142 = vector.shape_cast %141 : vector<1x1x1x128xf32> to vector<1x128xf32>
    %143 = vector.shape_cast %140 : vector<1x128xf32> to vector<1x1x1x128xf32>
    tpu.vector_store %arg3[%c0_63, %c1_64, %c0_65, %c0_66], %143 {strides = array<i32>} : memref<1x3x1x128xf32, #tpu.memory_space<vmem>>, vector<1x1x1x128xf32>,
    %144 = arith.mulf %75, %123 : vector<1x128xf32>
    %145 = arith.mulf %76, %124 : vector<1x128xf32>
    %146 = arith.addf %144, %145 : vector<1x128xf32>
    %147 = arith.mulf %77, %125 : vector<1x128xf32>
    %148 = arith.addf %146, %147 : vector<1x128xf32>
    %149 = math.absf %148 : vector<1x128xf32>
    %c0_67 = arith.constant 0 : index
    %c2_68 = arith.constant 2 : index
    %c0_69 = arith.constant 0 : index
    %c0_70 = arith.constant 0 : index
    %150 = vector.load %arg3[%c0_67, %c2_68, %c0_69, %c0_70] : memref<1x3x1x128xf32, #tpu.memory_space<vmem>>, vector<1x1x1x128xf32>
    %151 = vector.shape_cast %150 : vector<1x1x1x128xf32> to vector<1x128xf32>
    %152 = vector.shape_cast %149 : vector<1x128xf32> to vector<1x1x1x128xf32>
    tpu.vector_store %arg3[%c0_67, %c2_68, %c0_69, %c0_70], %152 {strides = array<i32>} : memref<1x3x1x128xf32, #tpu.memory_space<vmem>>, vector<1x1x1x128xf32>,
    return
  }
  func.func @transform_0(%arg0: i32, %arg1: i32) -> (i32, i32, i32, i32) {
    %c0_i32 = arith.constant 0 : i32
    %c0_i32_0 = arith.constant 0 : i32
    %c0_i32_1 = arith.constant 0 : i32
    return %arg0, %c0_i32, %arg1, %c0_i32_0 : i32, i32, i32, i32
  }
  func.func @transform_1(%arg0: i32, %arg1: i32) -> (i32, i32, i32, i32) {
    %c0_i32 = arith.constant 0 : i32
    %c0_i32_0 = arith.constant 0 : i32
    %c0_i32_1 = arith.constant 0 : i32
    return %arg0, %c0_i32, %arg1, %c0_i32_0 : i32, i32, i32, i32
  }
}

</mosaic_0001>

<bundles_post_ra>
// kernel: normal_vector_loss.1
= control target key start
LH: loop header
LB: loop body
LE: loop exit
PB: predicated region body
PF: predicated region fallthrough
CT: control target
= control target key end

     0   :  { %s511_s6 = smov 0   ;;  %s513_s7 = smov 0   ;;  %s644_s0 = inlined_call_operand.vmem [shape: f32[2,18,1,128], index: 0, kind: input, shape index: {}]   ;;  %s645_s1 = inlined_call_operand.vmem [shape: f32[2,3,1,128], index: 1, kind: output, shape index: {}]  }
   0x1   :  { %s515_s8 = smov 0  }
   0x2 LB: > { %s23_s9 = sadd.s32 1, %s495_s7  ;;  %p405_p0 = scmp.ge.s32.totalorder %s499_s8, 1  ;;  %s499_s8 = sphi %s515_s8, %s11_s8   ;;  %s495_s7 = sphi %s513_s7, %s647_s7   ;;  %s491_s6 = sphi %s511_s6, %s646_s6  }
   0x3   : > { %p25_p1 = scmp.ge.s32.totalorder %s23_s9, 2  ;;  %p105_p2 = scmp.lt.s32.totalorder %s499_s8, 3 }
   0x5   : > { %s649_s9 = smov (%p25_p1, %s23_s9), 0  ;;  %p106_p3 = pnand %p405_p0, %p105_p2 }
   0x6   : > { %p129_p4 = scmp.lt.s32.totalorder (!%p106_p3), %s491_s6, 1 }
   0x7   : > { %109 = sbr.rel (%p106_p3) target bundleno = 109 (0x6d), region = 24 }
   0xe   : > { %s651_s6 = smov (!%p129_p4, %s491_s6), 1 }
   0xf   : > { %s427_s10 = smul.u32 18, %s651_s6 }
  0x10   : > { %s428_s14 = smul.u32 3, %s651_s6 }
  0x11   : > { %s535_s13 = scalar_lea.vmem %s644_s0, %s427_s10 }
  0x12   : > { %v414_v0 = vld [vmem:[%s535_s13 + $0x9] sm:$0x1]  ;;  %v415_v1 = vld [vmem:[%s535_s13 + $0xa] sm:$0x1]  ;;  %v416_v2 = vld [vmem:[%s535_s13 + $0xb] sm:$0x1]  ;;  %s142_s17 = scalar_lea.vmem %s645_s1, %s428_s14 }
  0x13   : > { %v417_v3 = vld [vmem:[%s535_s13 + $0xc] sm:$0x1]  ;;  %v418_v4 = vld [vmem:[%s535_s13 + $0xd] sm:$0x1]  ;;  %v419_v5 = vld [vmem:[%s535_s13 + $0xe] sm:$0x1]  ;;  %v543_v6 = vsub.f32 %v415_v1, %v414_v0  ;;  %v545_v7 = vsub.f32 %v416_v2, %v414_v0 }
  0x14   : > { %v420_v8 = vld [vmem:[%s535_s13 + $0xf] sm:$0x1]  ;;  %v421_v9 = vld [vmem:[%s535_s13 + $0x10] sm:$0x1]  ;;  %v422_v10 = vld [vmem:[%s535_s13 + $0x11] sm:$0x1]  ;;  %v550_v11 = vsub.f32 %v418_v4, %v417_v3  ;;  %v552_v12 = vsub.f32 %v419_v5, %v417_v3 }
  0x15   : > { %v554_v13 = vsub.f32 %v421_v9, %v420_v8  ;;  %v241_v14 = vmul.f32 %v543_v6, %v543_v6  ;;  %v558_v15 = vsub.f32 %v422_v10, %v420_v8  ;;  %v261_v16 = vmul.f32 %v545_v7, %v545_v7  ;;  %v143_v25 = vld [vmem:[%s535_s13] sm:$0x1]  ;;  %v406_v26 = vld [vmem:[%s535_s13 + $0x1] sm:$0x1]  ;;  %v408_v27 = vld [vmem:[%s535_s13 + $0x3] sm:$0x1] }
  0x16   : > { %v242_v17 = vmul.f32 %v550_v11, %v550_v11  ;;  %v262_v18 = vmul.f32 %v552_v12, %v552_v12  ;;  %v409_v28 = vld [vmem:[%s535_s13 + $0x4] sm:$0x1]  ;;  %v407_v29 = vld [vmem:[%s535_s13 + $0x2] sm:$0x1]  ;;  %v410_v30 = vld [vmem:[%s535_s13 + $0x5] sm:$0x1]  ;;  %v576_v31 = vsub.f32 %v406_v26, %v143_v25 }
  0x17   : > { %v244_v19 = vmul.f32 %v554_v13, %v554_v13  ;;  %v264_v20 = vmul.f32 %v558_v15, %v558_v15  ;;  %v578_v32 = vsub.f32 %v409_v28, %v408_v27  ;;  %v411_v34 = vld [vmem:[%s535_s13 + $0x6] sm:$0x1]  ;;  %v412_v35 = vld [vmem:[%s535_s13 + $0x7] sm:$0x1]  ;;  %v582_v37 = vsub.f32 %v407_v29, %v143_v25  ;;  %v413_v42 = vld [vmem:[%s535_s13 + $0x8] sm:$0x1] }
  0x18   : > { %v243_v21 = vadd.f32 %v242_v17, %v241_v14  ;;  %v263_v22 = vadd.f32 %v262_v18, %v261_v16  ;;  %v584_v38 = vsub.f32 %v410_v30, %v408_v27  ;;  %v587_v44 = vsub.f32 %v407_v29, %v406_v26 }
  0x19   : > { %v589_v45 = vsub.f32 %v410_v30, %v409_v28  ;;  %v591_v46 = vsub.f32 %v412_v35, %v411_v34  ;;  %v181_v47 = vmul.f32 %v576_v31, %v576_v31  ;;  %v182_v49 = vmul.f32 %v578_v32, %v578_v32 }
  0x1a   : > { %v245_v23 = vadd.f32 %v244_v19, %v243_v21  ;;  %v265_v24 = vadd.f32 %v264_v20, %v263_v22  ;;  %v598_v52 = vsub.f32 %v413_v42, %v411_v34  ;;  %v201_v55 = vmul.f32 %v582_v37, %v582_v37 }
  0x1b   : > { %v202_v56 = vmul.f32 %v584_v38, %v584_v38  ;;  %v604_v58 = vsub.f32 %v413_v42, %v412_v35  ;;  %v221_v59 = vmul.f32 %v587_v44, %v587_v44  ;;  %v222_v60 = vmul.f32 %v589_v45, %v589_v45 }
  0x1c   : > { %453 = vrsqrt.f32 %v245_v23  ;;  %vm248_vm0 = vcmp.eq.f32.partialorder %v245_v23, inf  ;;  %v251_v36 = vand.u32 2147483648, %v245_v23  ;;  %vm250_vm1 = vcmp.eq.f32.partialorder %v245_v23, 0.0 }
  0x1d   : > { %455 = vrsqrt.f32 %v265_v24  ;;  %vm268_vm2 = vcmp.eq.f32.partialorder %v265_v24, inf  ;;  %v271_v41 = vand.u32 2147483648, %v265_v24  ;;  %vm270_vm3 = vcmp.eq.f32.partialorder %v265_v24, 0.0 }
  0x1e   : > { %v183_v61 = vadd.f32 %v182_v49, %v181_v47  ;;  %v184_v62 = vmul.f32 %v591_v46, %v591_v46  ;;  %v203_v63 = vadd.f32 %v202_v56, %v201_v55  ;;  %v204_v0 = vmul.f32 %v598_v52, %v598_v52 }
  0x1f   : > { %v223_v1 = vadd.f32 %v222_v60, %v221_v59  ;;  %v224_v2 = vmul.f32 %v604_v58, %v604_v58 }
  0x20   : > { %v185_v3 = vadd.f32 %v184_v62, %v183_v61  ;;  %v205_v4 = vadd.f32 %v204_v0, %v203_v63 }
  0x21   : > { %v225_v5 = vadd.f32 %v224_v2, %v223_v1 }
  0x22   : > { %vm188_vm4 = vcmp.eq.f32.partialorder %v185_v3, inf  ;;  %vm208_vm5 = vcmp.eq.f32.partialorder %v205_v4, inf  ;;  %vm190_vm7 = vcmp.eq.f32.partialorder %v185_v3, 0.0  ;;  %vm210_vm8 = vcmp.eq.f32.partialorder %v205_v4, 0.0 }
  0x23   : > { %vm228_vm6 = vcmp.eq.f32.partialorder %v225_v5, inf  ;;  %v231_v42 = vand.u32 2147483648, %v225_v5  ;;  %vm230_vm9 = vcmp.eq.f32.partialorder %v225_v5, 0.0 }
  0x26   : > { %v454_v33 = vpop.eup %453 }
  0x27   : > { %v456_v39 = vpop.eup %455  ;;  %v247_v40 = vmul.f32 %v454_v33, %v245_v23 }
  0x28   : > { %v267_v43 = vmul.f32 %v456_v39, %v265_v24 }
  0x29   : > { %v249_v48 = vsel %vm248_vm0, %v245_v23, %v247_v40  ;;  %v211_v40 = vand.u32 2147483648, %v205_v4 }
  0x2a   : > { %v252_v50 = vsel %vm250_vm1, %v251_v36, %v249_v48  ;;  %v269_v51 = vsel %vm268_vm2, %v265_v24, %v267_v43  ;;  %v191_v36 = vand.u32 2147483648, %v185_v3 }
  0x2b   : > { %v253_v53 = vmax.f32 %v252_v50, 1e-12  ;;  %v272_v54 = vsel %vm270_vm3, %v271_v41, %v269_v51 }
  0x2c   : > { %v273_v57 = vmax.f32 %v272_v54, 1e-12 }
  0x2d   : > { %457 = vrcp.f32 %v253_v53 }
  0x2e   : > { %459 = vrcp.f32 %v273_v57 }
  0x2f   : > { %461 = vrsqrt.f32 %v185_v3 }
  0x30   : > { %463 = vrsqrt.f32 %v205_v4 }
  0x31   : > { %465 = vrsqrt.f32 %v225_v5 }
  0x37   : > { %v458_v8 = vpop.eup %457 }
  0x38   : > { %v460_v9 = vpop.eup %459  ;;  %v255_v10 = vmul.f32 %v458_v8, %v543_v6  ;;  %v256_v14 = vmul.f32 %v458_v8, %v550_v11  ;;  %v257_v16 = vmul.f32 %v458_v8, %v554_v13 }
  0x39   : > { %v275_v17 = vmul.f32 %v460_v9, %v545_v7  ;;  %v276_v18 = vmul.f32 %v460_v9, %v552_v12  ;;  %v277_v19 = vmul.f32 %v460_v9, %v558_v15  ;;  %v462_v29 = vpop.eup %461 }
  0x3a   : > { %v464_v30 = vpop.eup %463  ;;  %v187_v34 = vmul.f32 %v462_v29, %v185_v3 }
  0x3b   : > { %v278_v20 = vmul.f32 %v277_v19, %v256_v14  ;;  %v279_v21 = vmul.f32 %v276_v18, %v257_v16  ;;  %v281_v22 = vmul.f32 %v275_v17, %v257_v16  ;;  %v282_v23 = vmul.f32 %v277_v19, %v255_v10  ;;  %v466_v7 = vpop.eup %465 }
  0x3c   : > { %v284_v24 = vmul.f32 %v276_v18, %v255_v10  ;;  %v285_v25 = vmul.f32 %v275_v17, %v256_v14  ;;  %v207_v15 = vmul.f32 %v464_v30, %v205_v4  ;;  %v227_v35 = vmul.f32 %v466_v7, %v225_v5 }
  0x3d   : > { %v280_v26 = vsub.f32 %v278_v20, %v279_v21  ;;  %v283_v27 = vsub.f32 %v281_v22, %v282_v23  ;;  %v189_v39 = vsel %vm188_vm4, %v185_v3, %v187_v34 }
  0x3e   : > { %v286_v6 = vsub.f32 %v284_v24, %v285_v25  ;;  %v209_v41 = vsel %vm208_vm5, %v205_v4, %v207_v15  ;;  %v229_v43 = vsel %vm228_vm6, %v225_v5, %v227_v35  ;;  %v192_v47 = vsel %vm190_vm7, %v191_v36, %v189_v39 }
  0x3f   : > { %v287_v28 = vmul.f32 %v280_v26, %v280_v26  ;;  %v288_v11 = vmul.f32 %v283_v27, %v283_v27  ;;  %v212_v48 = vsel %vm210_vm8, %v211_v40, %v209_v41  ;;  %v232_v49 = vsel %vm230_vm9, %v231_v42, %v229_v43 }
  0x40   : > { %v290_v13 = vmul.f32 %v286_v6, %v286_v6  ;;  %v193_v50 = vmax.f32 %v192_v47, 1e-12  ;;  %v213_v51 = vmax.f32 %v212_v48, 1e-12  ;;  %v233_v55 = vmax.f32 %v232_v49, 1e-12 }
  0x41   : > { %v289_v33 = vadd.f32 %v288_v11, %v287_v28 }
  0x43   : > { %v291_v12 = vadd.f32 %v290_v13, %v289_v33 }
  0x45   : > { %467 = vrsqrt.f32 %v291_v12  ;;  %vm294_vm10 = vcmp.eq.f32.partialorder %v291_v12, inf  ;;  %v297_v54 = vand.u32 2147483648, %v291_v12  ;;  %vm296_vm11 = vcmp.eq.f32.partialorder %v291_v12, 0.0 }
  0x46   : > { %469 = vrcp.f32 %v193_v50 }
  0x47   : > { %471 = vrcp.f32 %v213_v51 }
  0x48   : > { %473 = vrcp.f32 %v233_v55 }
  0x4f   : > { %v468_v53 = vpop.eup %467 }
  0x50   : > { %v293_v56 = vmul.f32 %v468_v53, %v291_v12  ;;  %v470_v61 = vpop.eup %469 }
  0x51   : > { %v472_v62 = vpop.eup %471  ;;  %v195_v0 = vmul.f32 %v470_v61, %v576_v31  ;;  %v196_v1 = vmul.f32 %v470_v61, %v578_v32  ;;  %v197_v2 = vmul.f32 %v470_v61, %v591_v46 }
  0x52   : > { %v295_v57 = vsel %vm294_vm10, %v291_v12, %v293_v56  ;;  %v474_v63 = vpop.eup %473  ;;  %v215_v3 = vmul.f32 %v472_v62, %v582_v37  ;;  %v216_v5 = vmul.f32 %v472_v62, %v584_v38  ;;  %v217_v8 = vmul.f32 %v472_v62, %v598_v52 }
  0x53   : > { %v298_v59 = vsel %vm296_vm11, %v297_v54, %v295_v57  ;;  %v235_v9 = vmul.f32 %v474_v63, %v587_v44  ;;  %v236_v10 = vmul.f32 %v474_v63, %v589_v45  ;;  %v237_v31 = vmul.f32 %v474_v63, %v604_v58 }
  0x54   : > { %v299_v60 = vmax.f32 %v298_v59, 1e-12 }
  0x56   : > { %475 = vrcp.f32 %v299_v60 }
  0x60   : > { %v476_v4 = vpop.eup %475 }
  0x61   : > { %v301_v14 = vmul.f32 %v476_v4, %v280_v26  ;;  %v302_v16 = vmul.f32 %v476_v4, %v283_v27  ;;  %v303_v17 = vmul.f32 %v476_v4, %v286_v6 }
  0x63   : > { %v304_v32 = vmul.f32 %v301_v14, %v195_v0  ;;  %v305_v18 = vmul.f32 %v302_v16, %v196_v1  ;;  %v307_v19 = vmul.f32 %v303_v17, %v197_v2  ;;  %v311_v46 = vmul.f32 %v301_v14, %v215_v3 }
  0x64   : > { %v312_v37 = vmul.f32 %v302_v16, %v216_v5  ;;  %v314_v20 = vmul.f32 %v303_v17, %v217_v8  ;;  %v319_v21 = vmul.f32 %v301_v14, %v235_v9  ;;  %v320_v38 = vmul.f32 %v302_v16, %v236_v10 }
  0x65   : > { %v306_v22 = vadd.f32 %v305_v18, %v304_v32  ;;  %v322_v52 = vmul.f32 %v303_v17, %v237_v31 }
  0x66   : > { %v313_v23 = vadd.f32 %v312_v37, %v311_v46  ;;  %v321_v44 = vadd.f32 %v320_v38, %v319_v21 }
  0x67   : > { %v308_v24 = vadd.f32 %v307_v19, %v306_v22 }
  0x68   : > { %v315_v45 = vadd.f32 %v314_v20, %v313_v23  ;;  %v323_v58 = vadd.f32 %v322_v52, %v321_v44 }
  0x69   : > { %v309_v25 = vand.u32 2147483647, %v308_v24 }
  0x6a   : > { %v316_v26 = vand.u32 2147483647, %v315_v45  ;;  %v324_v27 = vand.u32 2147483647, %v323_v58 }
  0x6b   : > { %310 = vst [vmem:[%s142_s17] sm:$0x1] %v309_v25 }
  0x6c   : > { %423 = vst [vmem:[%s142_s17 + $0x1] sm:$0x1] %v316_v26  ;;  %424 = vst [vmem:[%s142_s17 + $0x2] sm:$0x1] %v324_v27 }
  0x6d PF: > { %s11_s8 = sadd.s32 1, %s499_s8   ;;  %s646_s6 = smov %s495_s7 }
  0x6e   : > { %p8_p5 = scmp.ge.s32.totalorder %s11_s8, 4   ;;  %s647_s7 = smov %s649_s9 }
  0x70   :  { %10 = sbr.rel (!%p8_p5) target bundleno = 2 (0x2), region = 73 }

</bundles_post_ra>
